<compile_context>
chip_gen: v6e
topology: v6e:2x2x1
jax: 0.10.0
libtpu: 0.0.40
codegen_flags: <defaults>
</compile_context>

<pallas_src>
import functools

import jax
import jax.numpy as jnp
from jax import lax
from jax.experimental import pallas as pl
from jax.experimental.pallas import tpu as pltpu

_MIB = 1024 * 1024


def _round_up(x, m):
    return ((x + m - 1) // m) * m


def _tpu_budgets():
    """Generation-dependent VMEM budgets and TensorCore count.

    Returns (block_budget_bytes, vmem_limit_bytes, num_tensorcores).  The block
    budget covers the pipelined blocks: input + output, double-buffered => ~4x one
    block resident at a time.
    """
    vmem_bytes = None
    try:
        vmem_bytes = int(pltpu.get_tpu_info().vmem_capacity_bytes)
    except Exception:
        vmem_bytes = None

    kind = ""
    try:
        kind = jax.devices()[0].device_kind.lower()
    except Exception:
        pass
    is_v7 = "v7" in kind

    if vmem_bytes is None:
        vmem_bytes = 64 * _MIB if is_v7 else 128 * _MIB

    num_tc = 2 if is_v7 else 1   # v7x: 2 TensorCores share the "parallel" grid axis

    if vmem_bytes <= 64 * _MIB:
        # v7x: 64 MiB VMEM per TensorCore -> keep headroom below the physical cap.
        return 40 * _MIB, 48 * _MIB, num_tc
    # v5e / v6e: 128 MiB physical; the default scoped limit is only a floor.
    return 48 * _MIB, 64 * _MIB, num_tc


# ----------------------------------------------------------------------------
# Pallas kernel: LayerNorm with torch.std semantics (unbiased, d-1), matching
#   mean = x.mean(-1);  std = x.std(-1)
#   y    = a_2 * (x - mean) / sqrt(std**2 + eps) + b_2
# exactly as written in the spec's LayerNorm.forward.
# ----------------------------------------------------------------------------
def _layernorm_kernel(x_ref, a_ref, b_ref, o_ref, *, eps, d_valid):
    x = x_ref[...].astype(jnp.float32)                       # (row_tile, Dp)
    dp = x.shape[-1]

    if d_valid != dp:
        # Feature axis was padded to a lane-dense multiple of 128; mask the pad
        # lanes out of the reductions (they are sliced off in the wrapper).
        lane = lax.broadcasted_iota(jnp.int32, x.shape, dimension=1)
        mask = lane < d_valid
        xs = jnp.where(mask, x, 0.0)
    else:
        mask = None
        xs = x

    s = jnp.sum(xs, axis=-1, keepdims=True)                   # (row_tile, 1)
    mean = s * (1.0 / d_valid)
    xc = x - mean
    xcm = jnp.where(mask, xc, 0.0) if mask is not None else xc
    # Centered (numerically robust) unbiased variance == std**2.
    ss = jnp.sum(xcm * xcm, axis=-1, keepdims=True)            # (row_tile, 1)
    var_unbiased = ss * (1.0 / (d_valid - 1))
    inv = lax.rsqrt(var_unbiased + eps)                        # 1/sqrt(std**2 + eps)

    a = a_ref[...].astype(jnp.float32)                         # (1, Dp)
    b = b_ref[...].astype(jnp.float32)                         # (1, Dp)
    o_ref[...] = (a * (xc * inv) + b).astype(o_ref.dtype)


def layernorm_pallas(x2d, a_2, b_2, *, eps=1e-6, row_tile=8192, donate_input=False):
    """x2d: [R, D];  a_2, b_2: [D].  Normalizes over the last (feature) axis."""
    R, D = x2d.shape
    dtype = x2d.dtype
    itemsize = jnp.dtype(dtype).itemsize

    # Lane-dense feature axis: pad D up to a multiple of 128 so stores are unmasked;
    # the true D is masked inside the kernel and the pad is sliced off afterwards.
    Dp = _round_up(D, 128)
    if Dp != D:
        x2d = jnp.pad(x2d, ((0, 0), (0, Dp - D)))
    a2 = jnp.pad(a_2.reshape(1, D), ((0, 0), (0, Dp - D))).astype(dtype)
    b2 = jnp.pad(b_2.reshape(1, D), ((0, 0), (0, Dp - D))).astype(dtype)

    block_budget, vmem_limit, num_tc = _tpu_budgets()
    bytes_per_row = Dp * itemsize

    # Clamp the row tile so (input + output) x double-buffering fits the VMEM budget.
    max_rows_vmem = max(8, (block_budget // (4 * bytes_per_row)) // 8 * 8)
    rt = min(int(row_tile), max_rows_vmem, _round_up(R, 8))

    if num_tc >= 2:
        # Multi-TensorCore chip (v7x): the single "parallel" grid axis is sharded
        # across TCs.  Make the step count a multiple of num_tc so no TC idles on an
        # odd tail, but only when each step's block stays >= ~1 MiB so the fixed
        # per-step overhead remains amortized.
        min_rows_per_step = max(8, _round_up((1 * _MIB) // bytes_per_row, 8))
        if R >= num_tc * min_rows_per_step:
            steps = _round_up(max(num_tc, pl.cdiv(R, rt)), num_tc)
            rt = min(rt, _round_up(pl.cdiv(R, steps), 8))

    grid = (pl.cdiv(R, rt),)                                   # masked tail if R % rt != 0

    out = pl.pallas_call(
        functools.partial(_layernorm_kernel, eps=eps, d_valid=D),
        out_shape=jax.ShapeDtypeStruct((R, Dp), dtype),
        grid=grid,
        in_specs=[
            pl.BlockSpec((rt, Dp), lambda i: (i, 0)),          # x row-tile
            pl.BlockSpec((1, Dp), lambda i: (0, 0)),           # a_2 (resident block)
            pl.BlockSpec((1, Dp), lambda i: (0, 0)),           # b_2 (resident block)
        ],
        out_specs=pl.BlockSpec((rt, Dp), lambda i: (i, 0)),
        input_output_aliases={0: 0} if donate_input else {},
        compiler_params=pltpu.CompilerParams(
            dimension_semantics=("parallel",),
            vmem_limit_bytes=vmem_limit,
        ),
    )(x2d, a2, b2)

    if Dp != D:
        out = out[:, :D]
    return out


# ----------------------------------------------------------------------------
# Decoder forward
# ----------------------------------------------------------------------------
def decoder_forward(x, memory, src_mask, tgt_mask, params, num_layers,
                    donate_input=False):
    """
    x:        [B, T, D]   target-side activations
    memory:   [B, S, D]   encoder output (consumed by the injected layer)
    src_mask, tgt_mask:   attention masks (consumed by the injected layer)
    params:   dict with 'a_2', 'b_2' (each [D]) for the final LayerNorm
    """
    # TODO(synk): the per-layer module (`layer` arg of Decoder.__init__) is an external
    # dependency whose forward is not defined in this source file, so the N-layer stack
    # is applied as identity.  When the layers are implemented (flash-attention +
    # tiled-matmul Pallas kernels), fuse this final LayerNorm into the last layer's
    # output-tile epilogue to remove one full HBM read+write of x.
    for _ in range(num_layers):
        x = x  # placeholder for layer(x, memory, src_mask, tgt_mask)

    B, T, D = x.shape
    y2d = layernorm_pallas(
        x.reshape(B * T, D),
        params["a_2"],
        params["b_2"],
        eps=1e-6,
        # Set True in production (x is dead after this call) to reuse x's HBM buffer;
        # kept False here so the demo below can compare against x post hoc.
        donate_input=donate_input,
    )
    return y2d.reshape(B, T, D)


if __name__ == "__main__":
    key = jax.random.PRNGKey(0)
    # Small but lane-dense demo shapes: d_model = 128 keeps the feature axis a full
    # vreg-lane width (unmasked stores); B*T = 64 rows -> a single small grid step.
    B, T, S, D, N = 4, 16, 20, 128, 2

    kx, km = jax.random.split(key)
    x = jax.random.normal(kx, (B, T, D), dtype=jnp.float32)
    memory = jax.random.normal(km, (B, S, D), dtype=jnp.float32)
    src_mask = jnp.ones((B, 1, S), dtype=jnp.bool_)
    tgt_mask = jnp.tril(jnp.ones((1, T, T), dtype=jnp.bool_))

    # Deterministic parameter init, matching LayerNorm.__init__ (ones / zeros).
    params = {
        "a_2": jnp.ones((D,), dtype=jnp.float32),
        "b_2": jnp.zeros((D,), dtype=jnp.float32),
    }

    out = decoder_forward(x, memory, src_mask, tgt_mask, params, num_layers=N,
                          donate_input=False)
    out = jax.block_until_ready(out)

    # Sanity check against a pure-JAX reference of the PyTorch math
    # (mean / unbiased std, y = a_2*(x-mean)/sqrt(std**2+eps)+b_2 as in the spec).
    eps = 1e-6
    mean = jnp.mean(x, axis=-1, keepdims=True)
    var_unbiased = jnp.sum((x - mean) ** 2, axis=-1, keepdims=True) / (D - 1)
    ref = params["a_2"] * (x - mean) / jnp.sqrt(var_unbiased + eps) + params["b_2"]
    assert jnp.allclose(out, ref, atol=1e-4, rtol=1e-4), "mismatch vs reference"

    print("KERNEL_OK")
</pallas_src>

<mosaic_0001>
module attributes {stable_mosaic.version = 11 : i64} {
  func.func @_layernorm_kernel(%arg0: i32, %arg1: memref<64x128xf32, #tpu.memory_space<vmem>>, %arg2: memref<1x128xf32, #tpu.memory_space<vmem>>, %arg3: memref<1x128xf32, #tpu.memory_space<vmem>>, %arg4: memref<64x128xf32, #tpu.memory_space<vmem>>) attributes {dimension_semantics = [#tpu.dimension_semantics<parallel>], iteration_bounds = array<i64: 1>, scalar_prefetch = 0 : i64, scratch_operands = 0 : i64, tpu.core_type = #tpu.core_type<tc>, window_params = [{transform_indices = @transform_0, window_bounds = array<i64: 64, 128>}, {pipeline_mode = #tpu.pipeline_mode<synchronous>, transform_indices = @transform_1, window_bounds = array<i64: 1, 128>}, {pipeline_mode = #tpu.pipeline_mode<synchronous>, transform_indices = @transform_2, window_bounds = array<i64: 1, 128>}, {transform_indices = @transform_3, window_bounds = array<i64: 64, 128>}]} {
    %c0 = arith.constant 0 : index
    %c0_0 = arith.constant 0 : index
    %0 = vector.load %arg1[%c0, %c0_0] : memref<64x128xf32, #tpu.memory_space<vmem>>, vector<64x128xf32>
    %cst = arith.constant dense<0.000000e+00> : vector<64xf32>
    %1 = vector.multi_reduction <add>, %0, %cst [1] : vector<64x128xf32> to vector<64xf32>
    %2 = vector.shape_cast %1 : vector<64xf32> to vector<64x1xf32>
    %cst_1 = arith.constant 7.812500e-03 : f32
    %3 = vector.broadcast %cst_1 : f32 to vector<64x1xf32>
    %4 = arith.mulf %2, %3 : vector<64x1xf32>
    %5 = vector.broadcast %4 : vector<64x1xf32> to vector<64x128xf32>
    %6 = arith.subf %0, %5 : vector<64x128xf32>
    %7 = arith.mulf %6, %6 : vector<64x128xf32>
    %cst_2 = arith.constant dense<0.000000e+00> : vector<64xf32>
    %8 = vector.multi_reduction <add>, %7, %cst_2 [1] : vector<64x128xf32> to vector<64xf32>
    %9 = vector.shape_cast %8 : vector<64xf32> to vector<64x1xf32>
    %cst_3 = arith.constant 0.00787401571 : f32
    %10 = vector.broadcast %cst_3 : f32 to vector<64x1xf32>
    %11 = arith.mulf %9, %10 : vector<64x1xf32>
    %cst_4 = arith.constant 9.99999997E-7 : f32
    %12 = vector.broadcast %cst_4 : f32 to vector<64x1xf32>
    %13 = arith.addf %11, %12 : vector<64x1xf32>
    %14 = math.rsqrt %13 : vector<64x1xf32>
    %c0_5 = arith.constant 0 : index
    %c0_6 = arith.constant 0 : index
    %15 = vector.load %arg2[%c0_5, %c0_6] : memref<1x128xf32, #tpu.memory_space<vmem>>, vector<1x128xf32>
    %c0_7 = arith.constant 0 : index
    %c0_8 = arith.constant 0 : index
    %16 = vector.load %arg3[%c0_7, %c0_8] : memref<1x128xf32, #tpu.memory_space<vmem>>, vector<1x128xf32>
    %17 = vector.broadcast %14 : vector<64x1xf32> to vector<64x128xf32>
    %18 = arith.mulf %6, %17 : vector<64x128xf32>
    %19 = vector.broadcast %15 : vector<1x128xf32> to vector<64x128xf32>
    %20 = arith.mulf %19, %18 : vector<64x128xf32>
    %21 = vector.broadcast %16 : vector<1x128xf32> to vector<64x128xf32>
    %22 = arith.addf %20, %21 : vector<64x128xf32>
    %c0_9 = arith.constant 0 : index
    %c0_10 = arith.constant 0 : index
    %23 = vector.load %arg4[%c0_9, %c0_10] : memref<64x128xf32, #tpu.memory_space<vmem>>, vector<64x128xf32>
    tpu.vector_store %arg4[%c0_9, %c0_10], %22 {strides = array<i32>} : memref<64x128xf32, #tpu.memory_space<vmem>>, vector<64x128xf32>,
    return
  }
  func.func @transform_0(%arg0: i32) -> (i32, i32) {
    %c0_i32 = arith.constant 0 : i32
    %c0_i32_0 = arith.constant 0 : i32
    return %arg0, %c0_i32 : i32, i32
  }
  func.func @transform_1(%arg0: i32) -> (i32, i32) {
    %c0_i32 = arith.constant 0 : i32
    %c0_i32_0 = arith.constant 0 : i32
    %c0_i32_1 = arith.constant 0 : i32
    return %c0_i32, %c0_i32_0 : i32, i32
  }
  func.func @transform_2(%arg0: i32) -> (i32, i32) {
    %c0_i32 = arith.constant 0 : i32
    %c0_i32_0 = arith.constant 0 : i32
    %c0_i32_1 = arith.constant 0 : i32
    return %c0_i32, %c0_i32_0 : i32, i32
  }
  func.func @transform_3(%arg0: i32) -> (i32, i32) {
    %c0_i32 = arith.constant 0 : i32
    %c0_i32_0 = arith.constant 0 : i32
    return %arg0, %c0_i32 : i32, i32
  }
}

</mosaic_0001>

<bundles_post_ra>
// kernel: tpu_custom_call.1
= control target key start
LH: loop header
LB: loop body
LE: loop exit
PB: predicated region body
PF: predicated region fallthrough
CT: control target
= control target key end

     0   :  { %8 = vsyncpa [#allocation3], 0  ;;  %s328_s0 = inlined_call_operand.hbm [shape: f32[64,128], index: 0, kind: input, shape index: {}]   ;;  %s329_s1 = inlined_call_operand.vmem [shape: f32[1,128], index: 1, kind: input, shape index: {}]   ;;  %s330_s2 = inlined_call_operand.vmem [shape: f32[1,128], index: 2, kind: input, shape index: {}]   ;;  %s331_s3 = inlined_call_operand.hbm [shape: f32[64,128], index: 3, kind: output, shape index: {}]  }
   0x1   :  { %9 = vsyncpa [#allocation4], 0  ;;  %s246_s12 = smov [#allocation2]  }
   0x2   :  { %s15_s13 = sshll.u32 %s246_s12, 4  ;;  %s16_s13 = int_to_ptr.vmem [resolvable:$true] %s15_s13 }
   0x3   :  { %s210_s14 = scalar_lea.vmem %s16_s13, 1024  ;;  %p215_p1 = scmp.lt.s32.totalorder %s16_s13, %s16_s13 }
   0x4   :  { %p211_p0 = scmp.ne.s32.totalorder %s16_s13, %s210_s14  ;;  %p216_p2 = scmp.lt.s32.totalorder %s210_s14, %s210_s14 }
   0x6   :  { %p217_p3 = por %p216_p2, %p215_p1 }
   0x8   :  { %p218_p4 = pnand %p217_p3, %p211_p0 }
   0xa   :  { %221 = shalt.err (!%p218_p4)
}
   0xb   :  { %s247_s15 = smov 128   ;;  %s248_s16 = smov 8  }
   0xc   :  { %21 = dma.hbm_to_vmem [thread:$0]  %s328_s0, 1024, %s16_s13, [#allocation3], %s247_s15, %s247_s15, %s248_s16  }
   0xd   :  { %242 = dma.done.wait [#allocation3], 1024  }
   0xe   :  { %243 = vsyncadd [#allocation3], 4294966272  ;;  %v29_v0 = vld [vmem:[#allocation2] sm:$0xff]  ;;  %v31_v1 = vld [vmem:[#allocation2 + $0x10] sm:$0xff] }
   0xf   :  { %37 = vadd.xlane.f32.xlu0 %v29_v0  ;;  %41 = vadd.xlane.f32.xlu1 %v31_v1  ;;  %v30_v2 = vld [vmem:[#allocation2 + $0x8] sm:$0xff]  ;;  %v32_v3 = vld [vmem:[#allocation2 + $0x18] sm:$0xff]  ;;  %v33_v4 = vld [vmem:[#allocation2 + $0x20] sm:$0xff] }
  0x10   :  { %v34_v5 = vld [vmem:[#allocation2 + $0x28] sm:$0xff]  ;;  %v35_v6 = vld [vmem:[#allocation2 + $0x30] sm:$0xff]  ;;  %v36_v7 = vld [vmem:[#allocation2 + $0x38] sm:$0xff] }
  0x13   :  { %39 = vadd.xlane.f32.xlu0 %v30_v2  ;;  %43 = vadd.xlane.f32.xlu1 %v32_v3 }
  0x17   :  { %45 = vadd.xlane.f32.xlu0 %v33_v4  ;;  %47 = vadd.xlane.f32.xlu1 %v34_v5 }
  0x1b   :  { %49 = vadd.xlane.f32.xlu0 %v35_v6  ;;  %51 = vadd.xlane.f32.xlu1 %v36_v7 }
  0x98   :  { %v38_v8 = vpop.xlane.xlu0 %37  ;;  %v42_v9 = vpop.xlane.xlu1 %41 }
  0x99   :  { %v53_v10 = vmul.f32 0.0078125, %v38_v8  ;;  %v55_v11 = vmul.f32 0.0078125, %v42_v9 }
  0x9b   :  { %v276_v12 = vsub.f32 %v29_v0, %v53_v10  ;;  %v278_v13 = vsub.f32 %v31_v1, %v55_v11  ;;  %v180_v0 = vld [vmem:[%s329_s1] ss:$0 sm:$0xff]  ;;  %s249_s1 = smov [#allocation5]  }
  0x9c   :  { %v40_v14 = vpop.xlane.xlu0 %39  ;;  %v44_v15 = vpop.xlane.xlu1 %43 }
  0x9d   :  { %v54_v16 = vmul.f32 0.0078125, %v40_v14  ;;  %v69_v17 = vmul.f32 %v276_v12, %v276_v12  ;;  %v56_v18 = vmul.f32 0.0078125, %v44_v15  ;;  %v71_v21 = vmul.f32 %v278_v13, %v278_v13 }
  0x9f   :  { %v282_v19 = vsub.f32 %v30_v2, %v54_v16  ;;  %77 = vadd.xlane.f32.xlu0 %v69_v17  ;;  %v284_v20 = vsub.f32 %v32_v3, %v56_v18  ;;  %v181_v3 = vld [vmem:[%s330_s2] ss:$0 sm:$0xff]  ;;  %s168_s2 = sshll.u32 %s249_s1, 4  ;;  %s169_s2 = int_to_ptr.vmem [resolvable:$true] %s168_s2 }
  0xa0   :  { %v46_v22 = vpop.xlane.xlu0 %45  ;;  %v48_v23 = vpop.xlane.xlu1 %47  ;;  %s222_s22 = scalar_lea.vmem %s169_s2, 1024  ;;  %p227_p6 = scmp.lt.s32.totalorder %s169_s2, %s169_s2 }
  0xa1   :  { %v57_v24 = vmul.f32 0.0078125, %v46_v22  ;;  %v70_v25 = vmul.f32 %v282_v19, %v282_v19  ;;  %v58_v26 = vmul.f32 0.0078125, %v48_v23  ;;  %v72_v29 = vmul.f32 %v284_v20, %v284_v20  ;;  %p223_p5 = scmp.ne.s32.totalorder %s169_s2, %s222_s22  ;;  %p228_p7 = scmp.lt.s32.totalorder %s222_s22, %s222_s22 }
  0xa3   :  { %v290_v27 = vsub.f32 %v33_v4, %v57_v24  ;;  %81 = vadd.xlane.f32.xlu0 %v71_v21  ;;  %79 = vadd.xlane.f32.xlu1 %v70_v25  ;;  %v292_v28 = vsub.f32 %v34_v5, %v58_v26  ;;  %p229_p8 = por %p228_p7, %p227_p6 }
  0xa4   :  { %v50_v30 = vpop.xlane.xlu0 %49  ;;  %v52_v31 = vpop.xlane.xlu1 %51 }
  0xa5   :  { %v59_v32 = vmul.f32 0.0078125, %v50_v30  ;;  %v73_v33 = vmul.f32 %v290_v27, %v290_v27  ;;  %v60_v34 = vmul.f32 0.0078125, %v52_v31  ;;  %v74_v37 = vmul.f32 %v292_v28, %v292_v28  ;;  %p230_p9 = pnand %p229_p8, %p223_p5 }
  0xa7   :  { %v298_v35 = vsub.f32 %v35_v6, %v59_v32  ;;  %83 = vadd.xlane.f32.xlu1 %v72_v29  ;;  %85 = vadd.xlane.f32.xlu0 %v73_v33  ;;  %v300_v36 = vsub.f32 %v36_v7, %v60_v34 }
  0xa9   :  { %v75_v38 = vmul.f32 %v298_v35, %v298_v35  ;;  %v76_v39 = vmul.f32 %v300_v36, %v300_v36 }
  0xab   :  { %87 = vadd.xlane.f32.xlu1 %v74_v37  ;;  %89 = vadd.xlane.f32.xlu0 %v75_v38 }
  0xaf   :  { %91 = vadd.xlane.f32.xlu1 %v76_v39 }
 0x128   :  { %v78_v40 = vpop.xlane.xlu0 %77 }
 0x129   :  { %v93_v41 = vmul.f32 0.007874016, %v78_v40 }
 0x12b   :  { %v101_v42 = vadd.f32 1e-06, %v93_v41 }
 0x12c   :  { %v80_v43 = vpop.xlane.xlu1 %79  ;;  %v82_v44 = vpop.xlane.xlu0 %81 }
 0x12d   :  { %186 = vrsqrt.f32 %v101_v42  ;;  %v94_v45 = vmul.f32 0.007874016, %v80_v43  ;;  %v95_v46 = vmul.f32 0.007874016, %v82_v44 }
 0x12f   :  { %v102_v47 = vadd.f32 1e-06, %v94_v45  ;;  %v103_v48 = vadd.f32 1e-06, %v95_v46 }
 0x130   :  { %v84_v49 = vpop.xlane.xlu1 %83  ;;  %v86_v50 = vpop.xlane.xlu0 %85 }
 0x131   :  { %188 = vrsqrt.f32 %v102_v47  ;;  %v96_v51 = vmul.f32 0.007874016, %v84_v49  ;;  %v97_v52 = vmul.f32 0.007874016, %v86_v50 }
 0x132   :  { %190 = vrsqrt.f32 %v103_v48 }
 0x133   :  { %v104_v53 = vadd.f32 1e-06, %v96_v51  ;;  %v105_v54 = vadd.f32 1e-06, %v97_v52 }
 0x134   :  { %v88_v55 = vpop.xlane.xlu1 %87  ;;  %v90_v56 = vpop.xlane.xlu0 %89 }
 0x135   :  { %192 = vrsqrt.f32 %v104_v53  ;;  %v98_v57 = vmul.f32 0.007874016, %v88_v55  ;;  %v99_v58 = vmul.f32 0.007874016, %v90_v56 }
 0x136   :  { %194 = vrsqrt.f32 %v105_v54 }
 0x137   :  { %v106_v59 = vadd.f32 1e-06, %v98_v57  ;;  %v107_v60 = vadd.f32 1e-06, %v99_v58 }
 0x138   :  { %v92_v61 = vpop.xlane.xlu1 %91 }
 0x139   :  { %196 = vrsqrt.f32 %v106_v59  ;;  %v100_v62 = vmul.f32 0.007874016, %v92_v61 }
 0x13a   :  { %v187_v63 = vpop.eup %186  ;;  %198 = vrsqrt.f32 %v107_v60 }
 0x13b   :  { %v119_v1 = vmul.f32 %v187_v63, %v276_v12  ;;  %v108_v2 = vadd.f32 1e-06, %v100_v62 }
 0x13d   :  { %v133_v4 = vmul.f32 %v180_v0, %v119_v1  ;;  %200 = vrsqrt.f32 %v108_v2 }
 0x13e   :  { %v189_v5 = vpop.eup %188 }
 0x13f   :  { %v191_v6 = vpop.eup %190  ;;  %v147_v7 = vadd.f32 %v181_v3, %v133_v4  ;;  %v120_v8 = vmul.f32 %v189_v5, %v282_v19 }
 0x140   :  { %v121_v9 = vmul.f32 %v191_v6, %v278_v13 }
 0x141   :  { %155 = vst [vmem:[#allocation5] sm:$0xff] %v147_v7  ;;  %v134_v10 = vmul.f32 %v180_v0, %v120_v8 }
 0x142   :  { %v193_v11 = vpop.eup %192  ;;  %v135_v14 = vmul.f32 %v180_v0, %v121_v9 }
 0x143   :  { %v195_v15 = vpop.eup %194  ;;  %v148_v12 = vadd.f32 %v181_v3, %v134_v10  ;;  %v122_v16 = vmul.f32 %v193_v11, %v284_v20 }
 0x144   :  { %v149_v17 = vadd.f32 %v181_v3, %v135_v14  ;;  %v123_v18 = vmul.f32 %v195_v15, %v290_v27 }
 0x145   :  { %156 = vst [vmem:[#allocation5 + $0x8] sm:$0xff] %v148_v12  ;;  %v136_v21 = vmul.f32 %v180_v0, %v122_v16 }
 0x146   :  { %v197_v22 = vpop.eup %196  ;;  %157 = vst [vmem:[#allocation5 + $0x10] sm:$0xff] %v149_v17  ;;  %v137_v23 = vmul.f32 %v180_v0, %v123_v18 }
 0x147   :  { %v199_v24 = vpop.eup %198  ;;  %v150_v19 = vadd.f32 %v181_v3, %v136_v21  ;;  %v124_v13 = vmul.f32 %v197_v22, %v292_v28 }
 0x148   :  { %v151_v25 = vadd.f32 %v181_v3, %v137_v23  ;;  %v125_v26 = vmul.f32 %v199_v24, %v298_v35 }
 0x149   :  { %158 = vst [vmem:[#allocation5 + $0x18] sm:$0xff] %v150_v19  ;;  %v138_v29 = vmul.f32 %v180_v0, %v124_v13 }
 0x14a   :  { %v201_v30 = vpop.eup %200  ;;  %159 = vst [vmem:[#allocation5 + $0x20] sm:$0xff] %v151_v25  ;;  %v139_v20 = vmul.f32 %v180_v0, %v125_v26 }
 0x14b   :  { %v152_v31 = vadd.f32 %v181_v3, %v138_v29  ;;  %v126_v27 = vmul.f32 %v201_v30, %v300_v36 }
 0x14c   :  { %v153_v32 = vadd.f32 %v181_v3, %v139_v20 }
 0x14d   :  { %160 = vst [vmem:[#allocation5 + $0x28] sm:$0xff] %v152_v31  ;;  %v140_v33 = vmul.f32 %v180_v0, %v126_v27 }
 0x14e   :  { %161 = vst [vmem:[#allocation5 + $0x30] sm:$0xff] %v153_v32 }
 0x14f   :  { %v154_v34 = vadd.f32 %v181_v3, %v140_v33 }
 0x151   :  { %162 = vst [vmem:[#allocation5 + $0x38] sm:$0xff] %v154_v34 }
 0x152   :  { %233 = shalt.err (!%p230_p9)
}
 0x153   :  { %174 = dma.vmem_to_hbm [thread:$0]  %s169_s2, 1024, %s331_s3, [#allocation4], %s247_s15, %s247_s15, %s248_s16  }
 0x154   :  { %244 = dma.done.wait [#allocation4], 1024  }
 0x155   :  { %245 = vsyncadd [#allocation4], 4294966272 }
 0x156   :  { %178 = vsyncpa [#allocation3], 1 }
 0x157   :  { %179 = vsyncpa [#allocation4], 1 }

</bundles_post_ra>
